<compile_context>
chip_gen: v7x
topology: tpu7x:2x2x1
jax: 0.10.0
libtpu: 0.0.40
codegen_flags: <defaults>
</compile_context>

<pallas_src>
import numpy as np
import jax
import jax.numpy as jnp
from jax import lax
from jax.experimental import pallas as pl
from jax.experimental.pallas import tpu as pltpu


def _round_up(x: int, m: int) -> int:
    return (x + m - 1) // m * m


def _make_ipnn_kernel(n_hidden: int):
    """Fused MLP kernel for a static number of hidden layers.

    Ref order: feat, W1, b1, (Wh, bh) * n_hidden, WoutT, boutT, out.
    """

    def kernel(*refs):
        feat_ref, w1_ref, b1_ref = refs[0], refs[1], refs[2]
        pos = 3
        hidden_refs = []
        for _ in range(n_hidden):
            hidden_refs.append((refs[pos], refs[pos + 1]))
            pos += 2
        wout_t_ref, bout_t_ref, out_ref = refs[pos], refs[pos + 1], refs[pos + 2]

        # ---- first MLP layer: single K=256 matmul on the pre-concatenated feature slab ----
        acc = jnp.dot(feat_ref[...], w1_ref[...],
                      preferred_element_type=jnp.float32)          # (Bt, Hp) f32
        h = jnp.maximum(acc + b1_ref[...], 0.0)                    # bias + ReLU on f32 acc
        # dropout: inference-mode identity (no-op)

        # ---- remaining hidden layers ------------------------------------------------------
        for w_ref, b_ref in hidden_refs:
            a = jnp.dot(h.astype(jnp.bfloat16), w_ref[...],
                        preferred_element_type=jnp.float32)
            h = jnp.maximum(a + b_ref[...], 0.0)

        # ---- head, written transposed so the HBM write is tiny & lane-dense ---------------
        # yt[o, b] = sum_h WoutT[o, h] * h[b, h]   (NT matmul, flash q@k^T style)
        yt = lax.dot_general(wout_t_ref[...], h.astype(jnp.bfloat16),
                             dimension_numbers=(((1,), (1,)), ((), ())),
                             preferred_element_type=jnp.float32)   # (8, Bt) f32
        out_ref[...] = yt + bout_t_ref[...]                        # row 0 is the real output

    return kernel


def ipnn_forward_pallas(params, x, *, block_b: int = 128, interpret: bool = False):
    """IPNNModel.forward: x = {'id': int32[B,F], 'value': f32[B,F]} -> f32[B].

    block_b: batch tile.  128 fills a v5e MXU; use 256-512 on v6e/v7x when B allows
    (and pick B a multiple of block_b to avoid batch padding).
    """
    ids, values = x['id'], x['value']
    emb_table = params['emb']                        # (nfeat, E)
    W1, b1 = params['W1'], params['b1']              # (F*E + P, H), (H,)
    hidden = params['hidden']                        # list of ((H,H), (H,))
    Wout, bout = params['Wout'], params['bout']      # (H, 1), (1,)

    B, F = ids.shape
    E = emb_table.shape[1]
    H = W1.shape[1]
    Kx = F * E
    P = F * (F - 1) // 2
    K = Kx + P
    assert W1.shape[0] == K

    # --- XLA glue: embedding gather + value scaling (f32), pairwise inner products (f32) ---
    # Inner products are computed in f32 and rounded to bf16 once below (matches reference).
    x_emb = emb_table[ids] * values[..., None]       # (B, F, E) f32
    x_flat = x_emb.reshape(B, Kx)                    # free reshape
    vi, vj = np.triu_indices(F, k=1)                 # same pair ordering as torch triu offset=1
    ip = jnp.sum(x_emb[:, vi, :] * x_emb[:, vj, :], axis=-1)   # (B, P) f32

    # --- lane-friendly padded shapes (zero padding -> identical math) ---
    Kp = _round_up(K, 128)                           # 256 for F=10, E=16
    Hp = _round_up(H, 128)
    Bt = block_b
    Bp = _round_up(B, Bt)

    f32, bf16 = jnp.float32, jnp.bfloat16

    # Single bf16 feature slab: [x_flat | inner_products | zero pad]  (512 B/sample)
    feat_p = (jnp.zeros((Bp, Kp), bf16)
              .at[:B, :Kx].set(x_flat.astype(bf16))
              .at[:B, Kx:K].set(ip.astype(bf16)))

    W1_p = jnp.zeros((Kp, Hp), bf16).at[:K, :H].set(W1.astype(bf16))
    b1_p = jnp.zeros((1, Hp), f32).at[0, :H].set(b1)

    hid_p = []
    for (W, b) in hidden:
        hid_p.append((jnp.zeros((Hp, Hp), bf16).at[:H, :H].set(W.astype(bf16)),
                      jnp.zeros((1, Hp), f32).at[0, :H].set(b)))

    # Transposed head, padded to 8 sublane rows (only row 0 is meaningful).
    WoutT_p = jnp.zeros((8, Hp), bf16).at[0, :H].set(Wout[:, 0].astype(bf16))
    boutT_p = jnp.zeros((8, 1), f32).at[0, 0].set(bout[0])

    # --- specs: activations stream over the batch grid; weights VMEM-resident --------------
    in_specs = [
        pl.BlockSpec((Bt, Kp), lambda i: (i, 0)),     # feat (streams)
        pl.BlockSpec((Kp, Hp), lambda i: (0, 0)),     # W1
        pl.BlockSpec((1, Hp), lambda i: (0, 0)),      # b1
    ]
    args = [feat_p, W1_p, b1_p]
    for (Wp, bp) in hid_p:
        in_specs += [pl.BlockSpec((Hp, Hp), lambda i: (0, 0)),
                     pl.BlockSpec((1, Hp), lambda i: (0, 0))]
        args += [Wp, bp]
    in_specs += [pl.BlockSpec((8, Hp), lambda i: (0, 0)),
                 pl.BlockSpec((8, 1), lambda i: (0, 0))]
    args += [WoutT_p, boutT_p]

    # Packed transposed output: (8, Bp), each grid step writes an (8, Bt) lane-dense slab.
    out_specs = pl.BlockSpec((8, Bt), lambda i: (0, i))

    kernel = _make_ipnn_kernel(len(hidden))

    out_p = pl.pallas_call(
        kernel,
        out_shape=jax.ShapeDtypeStruct((8, Bp), f32),
        grid_spec=pltpu.PrefetchScalarGridSpec(
            num_scalar_prefetch=0,
            grid=(Bp // Bt,),
            in_specs=in_specs,
            out_specs=out_specs,
        ),
        compiler_params=pltpu.CompilerParams(
            dimension_semantics=("parallel",),        # shards the batch loop across TCs on v7x
            vmem_limit_bytes=32 * 1024 * 1024,        # footprint is <1 MB; safe on v7x's 64 MiB
        ),
        interpret=interpret,
    )(*args)

    return out_p[0, :B]                               # row 0 == y.squeeze(1)


def ipnn_reference(params, x):
    """Pure-JAX reference of the PyTorch forward.  Pair inner products in f32 (like torch),
    matmul operands bf16 with f32 accumulation to mirror the kernel's MXU numerics."""
    ids, values = x['id'], x['value']
    emb_table = params['emb']
    x_emb = emb_table[ids] * values[..., None]                      # (B, F, E)
    B, F, E = x_emb.shape
    vi, vj = np.triu_indices(F, k=1)
    ip = jnp.sum(x_emb[:, vi, :] * x_emb[:, vj, :], axis=-1)        # (B, P)
    feat = jnp.concatenate([x_emb.reshape(B, F * E), ip], axis=1)

    def dense(a, w, b):
        return jnp.dot(a.astype(jnp.bfloat16), w.astype(jnp.bfloat16),
                       preferred_element_type=jnp.float32) + b

    h = jax.nn.relu(dense(feat, params['W1'], params['b1']))
    for (W, b) in params['hidden']:
        h = jax.nn.relu(dense(h, W, b))
    y = dense(h, params['Wout'], params['bout'])
    return y[:, 0]


if __name__ == "__main__":
    key = jax.random.PRNGKey(0)
    B, nfield, nemb = 256, 10, 16
    nfeat, mlp_layers, mlp_hid = 1000, 2, 128
    P = nfield * (nfield - 1) // 2
    ninput = nfield * nemb + P

    ks = jax.random.split(key, 12)
    params = dict(
        emb=jax.random.normal(ks[0], (nfeat, nemb), jnp.float32) * 0.1,
        W1=jax.random.normal(ks[1], (ninput, mlp_hid), jnp.float32) * 0.1,
        b1=jax.random.normal(ks[2], (mlp_hid,), jnp.float32) * 0.1,
        hidden=[(jax.random.normal(ks[3 + 2 * l], (mlp_hid, mlp_hid), jnp.float32) * 0.1,
                 jax.random.normal(ks[4 + 2 * l], (mlp_hid,), jnp.float32) * 0.1)
                for l in range(mlp_layers - 1)],
        Wout=jax.random.normal(ks[9], (mlp_hid, 1), jnp.float32) * 0.1,
        bout=jax.random.normal(ks[10], (1,), jnp.float32) * 0.1,
    )

    x = {
        'id': jax.random.randint(ks[11], (B, nfield), 0, nfeat, dtype=jnp.int32),
        'value': jax.random.uniform(jax.random.PRNGKey(1), (B, nfield), dtype=jnp.float32),
    }

    y = jax.block_until_ready(ipnn_forward_pallas(params, x, block_b=128))
    assert y.shape == (B,)

    y_ref = jax.block_until_ready(ipnn_reference(params, x))
    np.testing.assert_allclose(np.asarray(y), np.asarray(y_ref), rtol=2e-2, atol=2e-2)

    print("KERNEL_OK")
</pallas_src>

<mosaic_0001>
module attributes {stable_mosaic.version = 11 : i64} {
  func.func @kernel(%arg0: i32, %arg1: memref<128x256xbf16, #tpu.memory_space<vmem>>, %arg2: memref<256x128xbf16, #tpu.memory_space<vmem>>, %arg3: memref<1x128xf32, #tpu.memory_space<vmem>>, %arg4: memref<128x128xbf16, #tpu.memory_space<vmem>>, %arg5: memref<1x128xf32, #tpu.memory_space<vmem>>, %arg6: memref<8x128xbf16, #tpu.memory_space<vmem>>, %arg7: memref<8x1xf32, #tpu.memory_space<vmem>>, %arg8: memref<8x128xf32, #tpu.memory_space<vmem>>) attributes {dimension_semantics = [#tpu.dimension_semantics<parallel>], iteration_bounds = array<i64: 2>, scalar_prefetch = 0 : i64, scratch_operands = 0 : i64, tpu.core_type = #tpu.core_type<tc>, window_params = [{transform_indices = @transform_0, window_bounds = array<i64: 128, 256>}, {pipeline_mode = #tpu.pipeline_mode<synchronous>, transform_indices = @transform_1, window_bounds = array<i64: 256, 128>}, {pipeline_mode = #tpu.pipeline_mode<synchronous>, transform_indices = @transform_2, window_bounds = array<i64: 1, 128>}, {pipeline_mode = #tpu.pipeline_mode<synchronous>, transform_indices = @transform_3, window_bounds = array<i64: 128, 128>}, {pipeline_mode = #tpu.pipeline_mode<synchronous>, transform_indices = @transform_4, window_bounds = array<i64: 1, 128>}, {pipeline_mode = #tpu.pipeline_mode<synchronous>, transform_indices = @transform_5, window_bounds = array<i64: 8, 128>}, {pipeline_mode = #tpu.pipeline_mode<synchronous>, transform_indices = @transform_6, window_bounds = array<i64: 8, 1>}, {transform_indices = @transform_7, window_bounds = array<i64: 8, 128>}]} {
    %c0 = arith.constant 0 : index
    %c0_0 = arith.constant 0 : index
    %0 = vector.load %arg1[%c0, %c0_0] : memref<128x256xbf16, #tpu.memory_space<vmem>>, vector<128x256xbf16>
    %c0_1 = arith.constant 0 : index
    %c0_2 = arith.constant 0 : index
    %1 = vector.load %arg2[%c0_1, %c0_2] : memref<256x128xbf16, #tpu.memory_space<vmem>>, vector<256x128xbf16>
    %cst = arith.constant dense<0.000000e+00> : vector<128x128xf32>
    %2 = tpu.matmul %0, %1, %cst {dimension_numbers = #tpu.dot_dimension_numbers<[1], [0], [0], [1], [0, 0, 1, 1], [], []>} : vector<128x256xbf16>, vector<256x128xbf16>, vector<128x128xf32> -> vector<128x128xf32>
    %c0_3 = arith.constant 0 : index
    %c0_4 = arith.constant 0 : index
    %3 = vector.load %arg3[%c0_3, %c0_4] : memref<1x128xf32, #tpu.memory_space<vmem>>, vector<1x128xf32>
    %4 = vector.broadcast %3 : vector<1x128xf32> to vector<128x128xf32>
    %5 = arith.addf %2, %4 : vector<128x128xf32>
    %cst_5 = arith.constant 0.000000e+00 : f32
    %6 = vector.broadcast %cst_5 : f32 to vector<128x128xf32>
    %7 = arith.maximumf %5, %6 : vector<128x128xf32>
    %8 = arith.truncf %7 : vector<128x128xf32> to vector<128x128xbf16>
    %c0_6 = arith.constant 0 : index
    %c0_7 = arith.constant 0 : index
    %9 = vector.load %arg4[%c0_6, %c0_7] : memref<128x128xbf16, #tpu.memory_space<vmem>>, vector<128x128xbf16>
    %cst_8 = arith.constant dense<0.000000e+00> : vector<128x128xf32>
    %10 = tpu.matmul %8, %9, %cst_8 {dimension_numbers = #tpu.dot_dimension_numbers<[1], [0], [0], [1], [0, 0, 1, 1], [], []>} : vector<128x128xbf16>, vector<128x128xbf16>, vector<128x128xf32> -> vector<128x128xf32>
    %c0_9 = arith.constant 0 : index
    %c0_10 = arith.constant 0 : index
    %11 = vector.load %arg5[%c0_9, %c0_10] : memref<1x128xf32, #tpu.memory_space<vmem>>, vector<1x128xf32>
    %12 = vector.broadcast %11 : vector<1x128xf32> to vector<128x128xf32>
    %13 = arith.addf %10, %12 : vector<128x128xf32>
    %cst_11 = arith.constant 0.000000e+00 : f32
    %14 = vector.broadcast %cst_11 : f32 to vector<128x128xf32>
    %15 = arith.maximumf %13, %14 : vector<128x128xf32>
    %c0_12 = arith.constant 0 : index
    %c0_13 = arith.constant 0 : index
    %16 = vector.load %arg6[%c0_12, %c0_13] : memref<8x128xbf16, #tpu.memory_space<vmem>>, vector<8x128xbf16>
    %17 = arith.truncf %15 : vector<128x128xf32> to vector<128x128xbf16>
    %cst_14 = arith.constant dense<0.000000e+00> : vector<8x128xf32>
    %18 = tpu.matmul %16, %17, %cst_14 {dimension_numbers = #tpu.dot_dimension_numbers<[1], [1], [0], [0], [0, 0, 1, 0], [], []>} : vector<8x128xbf16>, vector<128x128xbf16>, vector<8x128xf32> -> vector<8x128xf32>
    %c0_15 = arith.constant 0 : index
    %c0_16 = arith.constant 0 : index
    %19 = vector.load %arg7[%c0_15, %c0_16] : memref<8x1xf32, #tpu.memory_space<vmem>>, vector<8x1xf32>
    %20 = vector.broadcast %19 : vector<8x1xf32> to vector<8x128xf32>
    %21 = arith.addf %18, %20 : vector<8x128xf32>
    %c0_17 = arith.constant 0 : index
    %c0_18 = arith.constant 0 : index
    %22 = vector.load %arg8[%c0_17, %c0_18] : memref<8x128xf32, #tpu.memory_space<vmem>>, vector<8x128xf32>
    tpu.vector_store %arg8[%c0_17, %c0_18], %21 {strides = array<i32>} : memref<8x128xf32, #tpu.memory_space<vmem>>, vector<8x128xf32>,
    return
  }
  func.func @transform_0(%arg0: i32) -> (i32, i32) {
    %c0_i32 = arith.constant 0 : i32
    %c0_i32_0 = arith.constant 0 : i32
    return %arg0, %c0_i32 : i32, i32
  }
  func.func @transform_1(%arg0: i32) -> (i32, i32) {
    %c0_i32 = arith.constant 0 : i32
    %c0_i32_0 = arith.constant 0 : i32
    %c0_i32_1 = arith.constant 0 : i32
    return %c0_i32, %c0_i32_0 : i32, i32
  }
  func.func @transform_2(%arg0: i32) -> (i32, i32) {
    %c0_i32 = arith.constant 0 : i32
    %c0_i32_0 = arith.constant 0 : i32
    %c0_i32_1 = arith.constant 0 : i32
    return %c0_i32, %c0_i32_0 : i32, i32
  }
  func.func @transform_3(%arg0: i32) -> (i32, i32) {
    %c0_i32 = arith.constant 0 : i32
    %c0_i32_0 = arith.constant 0 : i32
    %c0_i32_1 = arith.constant 0 : i32
    return %c0_i32, %c0_i32_0 : i32, i32
  }
  func.func @transform_4(%arg0: i32) -> (i32, i32) {
    %c0_i32 = arith.constant 0 : i32
    %c0_i32_0 = arith.constant 0 : i32
    %c0_i32_1 = arith.constant 0 : i32
    return %c0_i32, %c0_i32_0 : i32, i32
  }
  func.func @transform_5(%arg0: i32) -> (i32, i32) {
    %c0_i32 = arith.constant 0 : i32
    %c0_i32_0 = arith.constant 0 : i32
    %c0_i32_1 = arith.constant 0 : i32
    return %c0_i32, %c0_i32_0 : i32, i32
  }
  func.func @transform_6(%arg0: i32) -> (i32, i32) {
    %c0_i32 = arith.constant 0 : i32
    %c0_i32_0 = arith.constant 0 : i32
    %c0_i32_1 = arith.constant 0 : i32
    return %c0_i32, %c0_i32_0 : i32, i32
  }
  func.func @transform_7(%arg0: i32) -> (i32, i32) {
    %c0_i32 = arith.constant 0 : i32
    %c0_i32_0 = arith.constant 0 : i32
    return %c0_i32, %arg0 : i32, i32
  }
}

</mosaic_0001>

<bundles_post_ra>
// kernel: tpu_custom_call.1
= control target key start
LH: loop header
LB: loop body
LE: loop exit
PB: predicated region body
PF: predicated region fallthrough
CT: control target
= control target key end

     0   :  { %12 = vsyncpa [#allocation3], 0  ;;  %s1849_s0 = inlined_call_operand.hbm [shape: bf16[256,256], index: 0, kind: input, shape index: {}]   ;;  %s1850_s1 = inlined_call_operand.hbm [shape: bf16[256,128], index: 1, kind: input, shape index: {}]   ;;  %s1851_s2 = inlined_call_operand.vmem [shape: f32[1,128], index: 2, kind: input, shape index: {}]   ;;  %s1852_s3 = inlined_call_operand.hbm [shape: bf16[128,128], index: 3, kind: input, shape index: {}]   ;;  %s1853_s4 = inlined_call_operand.vmem [shape: f32[1,128], index: 4, kind: input, shape index: {}]   ;;  %s1854_s5 = inlined_call_operand.vmem [shape: bf16[8,128], index: 5, kind: input, shape index: {}]   ;;  %s1855_s6 = inlined_call_operand.vmem [shape: f32[8,1], index: 6, kind: input, shape index: {}]   ;;  %s1856_s7 = inlined_call_operand.hbm [shape: f32[8,256], index: 7, kind: output, shape index: {}]  }
   0x1   :  { %14 = vsyncpa [#allocation3 + $0x1], 0 }
   0x2   :  { %15 = vsyncpa [#allocation6], 0 }
   0x3   :  { %16 = vsyncpa [#allocation4], 0 }
   0x4   :  { %18 = vsyncpa [#allocation4 + $0x1], 0  ;;  %s1559_s24 = smov 0   ;;  %s1561_s25 = smov 0  }
   0x5   :  { %s1563_s26 = smov 0   ;;  %s1565_s27 = smov 0  }
   0x6 LB: > { %s1580_s28 = sadd.s32 4294967295, %s1506_s27   ;;  %s1024_s29 = sadd.s32 4294967294, %s1506_s27   ;;  %s1506_s27 = sphi %s1565_s27, %s1876_s27   ;;  %s1502_s26 = sphi %s1563_s26, %s1875_s26   ;;  %s1498_s25 = sphi %s1561_s25, %s1874_s25   ;;  %s1494_s24 = sphi %s1559_s24, %s1873_s24  }
   0x7   : > { %p44_p0 = scmp.ne.s32.totalorder %s1498_s25, %s1494_s24  ;;  %p1857_p1 = scmp.eq.s32.totalorder %s1580_s28, 0 }
   0x8   : > { %p200_p3 = scmp.eq.s32.totalorder %s1024_s29, 1  ;;  %p1025_p5 = scmp.ge.s32.totalorder %s1506_s27, 1 }
   0x9   : > { %p1589_p4 = por %p1857_p1, %p44_p0  ;;  %p207_p7 = scmp.lt.s32.totalorder %s1506_s27, 3 }
   0xa   : > { %p1594_p6 = por %p200_p3, %p44_p0  ;;  %s1508_s10 = smov [#allocation5]  }
   0xb   : > { %s1860_s30 = scalar_select %p1589_p4, 1, 0 }
   0xc   : > { %s1861_s8 = scalar_select %p1594_p6, 1, 0 }
   0xd   : > { %p1599_p8 = pnand %p1025_p5, %p207_p7  ;;  %s219_s11 = sshll.u32 %s1508_s10, 4  ;;  %s1603_s11 = int_to_ptr.vmem [resolvable:$true] %s219_s11 }
   0xe   : > { %s1509_s13 = smov [#allocation7]   ;;  %s1350_s17 = scalar_lea.hbm %s1850_s1, 2048 }
   0xf   : > { %p1239_p9 = pneg %p1599_p8  ;;  %s235_s14 = sshll.u32 %s1509_s13, 4  ;;  %s1614_s14 = int_to_ptr.vmem [resolvable:$true] %s235_s14 }
  0x10   : > { %p1351_p12 = scmp.ne.s32.totalorder %s1850_s1, %s1350_s17  ;;  %p1357_p5 = scmp.lt.u32.totalorder %s1350_s17, %s1850_s1 }
  0x11   : > { %p1610_p11 = pnand %p1239_p9, %p1857_p1 }
  0x13   : > { %p1352_p13 = pneg %p1610_p11 }
  0x15   : > { %p1353_p0 = pnand %p1352_p13, %p1351_p12 }
  0x17   : > { %p1354_p3 = pneg %p1353_p0 }
  0x19   : > { %p1359_p7 = pnand %p1357_p5, %p1354_p3 }
  0x1b   : > { %1362 = shalt.err (!%p1359_p7)
}
  0x1c   : > { %s1363_s22 = scalar_lea.vmem %s1603_s11, 2048  ;;  %p1371_p2 = scmp.lt.s32.totalorder %s1603_s11, %s1603_s11 }
  0x1d   : > { %p1364_p9 = scmp.ne.s32.totalorder %s1603_s11, %s1363_s22  ;;  %p1372_p12 = scmp.lt.s32.totalorder %s1363_s22, %s1363_s22 }
  0x1f   : > { %p1366_p10 = pnand %p1364_p9, %p1352_p13  ;;  %p1373_p0 = por %p1372_p12, %p1371_p2 }
  0x21   : > { %p1367_p1 = pneg %p1366_p10 }
  0x23   : > { %p1374_p6 = pnand %p1373_p0, %p1367_p1 }
  0x25   : > { %1377 = shalt.err (!%p1374_p6)
}
  0x26   : > { %s1510_s23 = smov 64   ;;  %s1511_s29 = smov 4  }
  0x27   : > { %1242 = dma.hbm_to_vmem [thread:$0]  (!%p1610_p11), %s1850_s1, 2048, %s1603_s11, [#allocation6], %s1510_s23, %s1510_s23, %s1511_s29  }
  0x28   : > { %s1378_s17 = scalar_lea.hbm %s1852_s3, 1024 }
  0x29   : > { %p1379_p2 = scmp.ne.s32.totalorder %s1852_s3, %s1378_s17  ;;  %p1385_p10 = scmp.lt.u32.totalorder %s1378_s17, %s1852_s3 }
  0x2b   : > { %p1381_p1 = pnand %p1379_p2, %p1352_p13 }
  0x2d   : > { %p1382_p6 = pneg %p1381_p1 }
  0x2f   : > { %p1387_p3 = pnand %p1385_p10, %p1382_p6 }
  0x31   : > { %1390 = shalt.err (!%p1387_p3)
}
  0x32   : > { %s1391_s11 = scalar_lea.vmem %s1614_s14, 1024  ;;  %p1399_p12 = scmp.lt.s32.totalorder %s1614_s14, %s1614_s14 }
  0x33   : > { %p1392_p5 = scmp.ne.s32.totalorder %s1614_s14, %s1391_s11  ;;  %p1400_p0 = scmp.lt.s32.totalorder %s1391_s11, %s1391_s11 }
  0x35   : > { %p1394_p7 = pnand %p1392_p5, %p1352_p13  ;;  %p1401_p2 = por %p1400_p0, %p1399_p12 }
  0x37   : > { %p1395_p9 = pneg %p1394_p7 }
  0x39   : > { %p1402_p1 = pnand %p1401_p2, %p1395_p9 }
  0x3b   : > { %1405 = shalt.err (!%p1402_p1)
}
  0x3c   : > { %1245 = dma.hbm_to_vmem [thread:$0]  (!%p1610_p11), %s1852_s3, 1024, %s1614_s14, [#allocation6], %s1510_s23, %s1510_s23, %s1511_s29  }
  0x3d   : > { %s1669_s13 = sadd.s32 1, %s1506_s27   ;;  %s31_s12 = sadd.s32 1, %s1502_s26 }
  0x3e   : > { %s28_s15 = ssub.s32 %s1506_s27, %s1669_s13  ;;  %p38_p13 = scmp.ne.s32.totalorder %s1502_s26, %s1498_s25 }
  0x3f   : > { %p29_p6 = scmp.eq.s32.totalorder %s28_s15, 0  ;;  %p39_p10 = scmp.eq.s32.totalorder %s1506_s27, 0 }
  0x40   : > { %p1864_p3 = scmp.eq.s32.totalorder %s1580_s28, 1  ;;  %p1256_p7 = scmp.lt.s32.totalorder %s1506_s27, 2 }
  0x41   : > { %s1685_s17 = scalar_select %p29_p6, %s1502_s26, %s31_s12  }
  0x42   : > { %p1679_p5 = por %p1864_p3, %p38_p13  ;;  %p40_p9 = por %p39_p10, %p38_p13 }
  0x43   : > { %s258_s18 = sand.u32 1, %s1502_s26   ;;  %s1085_s14 = sshll.u32 %s1506_s27, 11 }
  0x44   : > { %s1865_s16 = scalar_select %p1679_p5, 1, 0 }
  0x45   : > { %s1029_s19 = sshll.u32 %s258_s18, 7  ;;  %s1692_s20 = scalar_lea.hbm %s1849_s0, %s1085_s14 }
  0x46   : > { %s262_s21 = scalar_lea.vmem [#allocation2], %s1029_s19  ;;  %p1696_p11 = pnand %p1256_p7, %p40_p9 }
  0x47   : > { %s270_s11 = sshll.u32 %s262_s21, 4  ;;  %s1700_s10 = scalar_lea.sflag [#allocation3], %s258_s18  ;;  %s1694_s11 = int_to_ptr.vmem [resolvable:$true] %s270_s11 }
  0x48   : > { %s1406_s12 = scalar_lea.hbm %s1692_s20, 2048  ;;  %p1408_p0 = pneg %p1696_p11 }
  0x49   : > { %p1407_p12 = scmp.ne.s32.totalorder %s1692_s20, %s1406_s12  ;;  %s1411_s14 = scalar_lea.hbm %s1849_s0, 4096 }
  0x4a   : > { %p1412_p13 = scmp.lt.u32.totalorder %s1692_s20, %s1849_s0  ;;  %p1413_p6 = scmp.lt.u32.totalorder %s1411_s14, %s1406_s12 }
  0x4b   : > { %p1409_p2 = pnand %p1408_p0, %p1407_p12  ;;  %p1415_p3 = scmp.lt.u32.totalorder %s1406_s12, %s1692_s20 }
  0x4c   : > { %p1414_p10 = por %p1413_p6, %p1412_p13 }
  0x4d   : > { %p1410_p1 = pneg %p1409_p2 }
  0x4e   : > { %p1416_p7 = por %p1415_p3, %p1414_p10 }
  0x50   : > { %p1417_p9 = pnand %p1416_p7, %p1410_p1 }
  0x52   : > { %1420 = shalt.err (!%p1417_p9)
}
  0x53   : > { %s1421_s18 = scalar_lea.vmem %s1694_s11, 2048  ;;  %s1512_s21 = smov [#allocation2]  }
  0x54   : > { %p1422_p12 = scmp.ne.s32.totalorder %s1694_s11, %s1421_s18  ;;  %s1426_s15 = sshll.u32 %s1512_s21, 4  ;;  %s1427_s15 = int_to_ptr.vmem [resolvable:$false] %s1426_s15 }
  0x55   : > { %s1428_s19 = scalar_lea.vmem %s1427_s15, 4096  ;;  %p1429_p4 = scmp.lt.s32.totalorder %s1694_s11, %s1427_s15 }
  0x56   : > { %p1424_p2 = pnand %p1422_p12, %p1408_p0  ;;  %p1430_p13 = scmp.lt.s32.totalorder %s1428_s19, %s1421_s18 }
  0x58   : > { %p1425_p5 = pneg %p1424_p2  ;;  %p1431_p6 = por %p1430_p13, %p1429_p4 }
  0x5a   : > { %p1432_p10 = pnand %p1431_p6, %p1425_p5 }
  0x5c   : > { %1435 = shalt.err (!%p1432_p10)
}
  0x5d   : > { %s1513_s12 = smov 128   ;;  %s1514_s14 = smov 8  }
  0x5e   : > { %1249 = dma.hbm_to_vmem [thread:$0]  (!%p1696_p11), %s1692_s20, 2048, %s1694_s11, %s1700_s10, %s1513_s12, %s1513_s12, %s1514_s14  }
  0x5f   : > { %282 = sbr.rel (%p1599_p8) target bundleno = 882 (0x372), region = 48  ;;  %s1731_s23 = sand.u32 (!%p1599_p8), 1, %s1498_s25  }
  0x60   : > { %s1034_s29 = sshll.u32 (!%p1599_p8), %s1731_s23, 7  ;;  %s285_s18 = scalar_lea.sflag (!%p1599_p8), [#allocation3], %s1731_s23 }
  0x61   : > { %s1735_s21 = scalar_lea.vmem (!%p1599_p8), [#allocation2], %s1034_s29  ;;  %p1867_p4 = scmp.ne.s32.totalorder (!%p1599_p8), %s1860_s30, 0 }
  0x66   : > { %1481 = dma.done.wait (%p1867_p4), %s285_s18, 2048  }
  0x67   : > { %1483 = vsyncadd (%p1867_p4), %s285_s18, 4294965248  ;;  %p1868_p5 = scmp.eq.s32.totalorder %s1580_s28, 0 }
  0x69   : > { %1485 = dma.done.wait (%p1868_p5), [#allocation6], 3072   ;;  %p1869_p8 = pmov %p1868_p5 }
  0x6a   : > { %v1302_v0 = vld [vmem:[#allocation5 + $0x40] sm:$0xff]   ;;  %v1304_v2 = vld [vmem:[#allocation5 + $0x48] sm:$0xff]   ;;  %v1306_v4 = vld [vmem:[#allocation5 + $0x50] sm:$0xff]   ;;  %vm1516_vm0 = vmmov 0   ;;  %s1037_s12 = sshll.u32 %s1731_s23, 3  ;;  %s1081_s14 = sshll.u32 %s1580_s28, 7 }
  0x6b   : > { %1487 = vsyncadd (%p1869_p8), [#allocation6], 4294964224  ;;  %v1303_v1 = vld [vmem:[#allocation5] sm:$0xff]   ;;  %1086 = vmatprep.subr.bf16.mxu0 %v1302_v0  ;;  %v1305_v3 = vld [vmem:[#allocation5 + $0x8] sm:$0xff]   ;;  %s326_s29 = scalar_lea.vmem [#allocation8], %s1037_s12  ;;  %s1805_s9 = scalar_lea.hbm %s1856_s7, %s1081_s14 }
  0x6c   : > { %1087 = vmatpush3.bf16.msra.mxu0 %v1303_v1  ;;  %v1307_v5 = vld [vmem:[#allocation5 + $0x10] sm:$0xff]   ;;  %v1308_v6 = vld [vmem:[#allocation5 + $0x58] sm:$0xff]   ;;  %v1310_v8 = vld [vmem:[#allocation5 + $0x60] sm:$0xff]   ;;  %s935_s18 = sshll.u32 %s326_s29, 4  ;;  %s922_s20 = scalar_lea.sflag [#allocation4], %s1731_s23  ;;  %s1807_s18 = int_to_ptr.vmem [resolvable:$true] %s935_s18 }
  0x6d   : > { %1088 = vmatprep.subr.bf16.mxu0 %v1304_v2  ;;  %v1309_v7 = vld [vmem:[#allocation5 + $0x18] sm:$0xff]   ;;  %v1311_v9 = vld [vmem:[#allocation5 + $0x20] sm:$0xff]   ;;  %v1312_v10 = vld [vmem:[#allocation5 + $0x68] sm:$0xff]   ;;  %s1436_s28 = scalar_lea.vmem %s1807_s18, 128  ;;  %p1870_p0 = scmp.ne.s32.totalorder %s1865_s16, 0 }
  0x6e   : > { %v1320_v11 = vld [vmem:[%s1735_s21 + $0x4] ss:$8 sps:$4 sm:$0xff]   ;;  %v1314_v13 = vld [vmem:[#allocation5 + $0x70] sm:$0xff]   ;;  %v1316_v15 = vld [vmem:[#allocation5 + $0x78] sm:$0xff]   ;;  %p1437_p11 = scmp.ne.s32.totalorder %s1807_s18, %s1436_s28  ;;  %s1518_s11 = smov [#allocation8]  }
  0x6f   : > { %v1313_v12 = vld [vmem:[#allocation5 + $0x28] sm:$0xff]   ;;  %592 = vmatprep.mubr.bf16.mxu0 %v1320_v11  ;;  %v1315_v14 = vld [vmem:[#allocation5 + $0x30] sm:$0xff]   ;;  %v1317_v16 = vld [vmem:[#allocation5 + $0x38] sm:$0xff]   ;;  %s1440_s22 = sshll.u32 %s1518_s11, 4  ;;  %s1441_s22 = int_to_ptr.vmem [resolvable:$false] %s1440_s22 }
  0x70   : > { %1089 = vmatpush3.bf16.msra.mxu0 %v1305_v3  ;;  %v1342_v17 = vld [vmem:[#allocation7] sm:$0xff]   ;;  %v1343_v19 = vld [vmem:[#allocation7 + $0x8] sm:$0xff]   ;;  %v1321_v20 = vld [vmem:[%s1735_s21 + $0x14] ss:$8 sps:$4 sm:$0xff]   ;;  %p1438_p1 = pnand %p1437_p11, %p1870_p0  ;;  %s1442_s10 = scalar_lea.vmem %s1441_s22, 256 }
  0x71   : > { %1090 = vmatprep.subr.bf16.mxu0 %v1306_v4  ;;  %v1318_v18 = vld [vmem:[%s1735_s21] ss:$8 sps:$4 sm:$0xff]   ;;  %1175 = vmatprep.subr.bf16.mxu1 %v1342_v17  ;;  %v1344_v21 = vld [vmem:[#allocation7 + $0x10] sm:$0xff]   ;;  %v1324_v23 = vld [vmem:[%s1735_s21 + $0x24] ss:$8 sps:$4 sm:$0xff]   ;;  %p1443_p7 = scmp.lt.s32.totalorder %s1807_s18, %s1441_s22  ;;  %p1444_p9 = scmp.lt.s32.totalorder %s1442_s10, %s1436_s28 }
  0x72   : > { %1176 = vmatpush3.bf16.msra.mxu1 %v1342_v17  ;;  %v1323_v22 = vld [vmem:[%s1735_s21 + $0x10] ss:$8 sps:$4 sm:$0xff]   ;;  %v1326_v24 = vld [vmem:[%s1735_s21 + $0x20] ss:$8 sps:$4 sm:$0xff]   ;;  %v1327_v25 = vld [vmem:[%s1735_s21 + $0x34] ss:$8 sps:$4 sm:$0xff]   ;;  %p1439_p3 = pneg %p1438_p1 }
  0x73   : > { %1177 = vmatprep.subr.bf16.mxu1 %v1343_v19  ;;  %v1329_v26 = vld [vmem:[%s1735_s21 + $0x30] ss:$8 sps:$4 sm:$0xff]   ;;  %v1330_v27 = vld [vmem:[%s1735_s21 + $0x44] ss:$8 sps:$4 sm:$0xff]   ;;  %v1332_v28 = vld [vmem:[%s1735_s21 + $0x40] ss:$8 sps:$4 sm:$0xff]   ;;  %p1445_p12 = por %p1444_p9, %p1443_p7 }
  0x74   : > { %1091 = vmatpush3.bf16.msra.mxu0 %v1307_v5  ;;  %v1333_v29 = vld [vmem:[%s1735_s21 + $0x54] ss:$8 sps:$4 sm:$0xff]   ;;  %v1335_v30 = vld [vmem:[%s1735_s21 + $0x50] ss:$8 sps:$4 sm:$0xff]   ;;  %v1336_v31 = vld [vmem:[%s1735_s21 + $0x64] ss:$8 sps:$4 sm:$0xff]  }
  0x75   : > { %1092 = vmatprep.subr.bf16.mxu0 %v1308_v6  ;;  %v1338_v32 = vld [vmem:[%s1735_s21 + $0x60] ss:$8 sps:$4 sm:$0xff]   ;;  %v1339_v33 = vld [vmem:[%s1735_s21 + $0x74] ss:$8 sps:$4 sm:$0xff]   ;;  %v1341_v34 = vld [vmem:[%s1735_s21 + $0x70] ss:$8 sps:$4 sm:$0xff]   ;;  %p1446_p2 = pnand %p1445_p12, %p1439_p3 }
  0x76   : > { %1178 = vmatpush3.bf16.msra.mxu1 %v1343_v19  ;;  %v1345_v35 = vld [vmem:[#allocation7 + $0x18] sm:$0xff]   ;;  %v1346_v36 = vld [vmem:[#allocation7 + $0x20] sm:$0xff]   ;;  %v1347_v37 = vld [vmem:[#allocation7 + $0x28] sm:$0xff]  }
  0x77   : > { %1179 = vmatprep.subr.bf16.mxu1 %v1344_v21  ;;  %v1348_v38 = vld [vmem:[#allocation7 + $0x30] sm:$0xff]   ;;  %v1349_v39 = vld [vmem:[#allocation7 + $0x38] sm:$0xff]   ;;  %v1764_v42 = vld [vmem:[%s1851_s2] ss:$0 sm:$0xff] }
  0x78   : > { %1093 = vmatpush3.bf16.msra.mxu0 %v1309_v7 }
  0x79   : > { %1094 = vmatprep.subr.bf16.mxu0 %v1310_v8 }
  0x7a   : > { %1180 = vmatpush3.bf16.msra.mxu1 %v1344_v21 }
  0x7b   : > { %1181 = vmatprep.subr.bf16.mxu1 %v1345_v35 }
  0x7c   : > { %1095 = vmatpush3.bf16.msra.mxu0 %v1311_v9 }
  0x7d   : > { %1096 = vmatprep.subr.bf16.mxu0 %v1312_v10 }
  0x7e   : > { %1182 = vmatpush3.bf16.msra.mxu1 %v1345_v35 }
  0x7f   : > { %1183 = vmatprep.subr.bf16.mxu1 %v1346_v36 }
  0x80   : > { %1097 = vmatpush3.bf16.msra.mxu0 %v1313_v12 }
  0x81   : > { %1098 = vmatprep.subr.bf16.mxu0 %v1314_v13 }
  0x82   : > { %1184 = vmatpush3.bf16.msra.mxu1 %v1346_v36 }
  0x83   : > { %1185 = vmatprep.subr.bf16.mxu1 %v1347_v37 }
  0x84   : > { %1099 = vmatpush3.bf16.msra.mxu0 %v1315_v14 }
  0x85   : > { %1100 = vmatprep.subr.bf16.mxu0 %v1316_v15 }
  0x86   : > { %1186 = vmatpush3.bf16.msra.mxu1 %v1347_v37 }
  0x87   : > { %1187 = vmatprep.subr.bf16.mxu1 %v1348_v38 }
  0x88   : > { %1101 = vmatpush3.bf16.msra.mxu0 %v1317_v16 }
  0x8a   : > { %1188 = vmatpush3.bf16.msra.mxu1 %v1348_v38 }
  0x8b   : > { %593 = vmatmul.mubr.bf16.vlgmr.msra.gmra.mrb[0].mxu0 %v1318_v18  ;;  %1189 = vmatprep.subr.bf16.mxu1 %v1349_v39 }
  0x8c   : > { %600 = vmatprep.mubr.bf16.mxu0 %v1321_v20 }
  0x8e   : > { %1190 = vmatpush3.bf16.msra.mxu1 %v1349_v39 }
  0x93   : > { %601 = vmatmul.mubr.bf16.gmra.mrb[4].mxu0 %v1323_v22 }
  0x94   : > { %608 = vmatprep.mubr.bf16.mxu0 %v1324_v23 }
  0x9b   : > { %609 = vmatmul.mubr.bf16.gmra.mrb[8].mxu0 %v1326_v24 }
  0x9c   : > { %616 = vmatprep.mubr.bf16.mxu0 %v1327_v25 }
  0xa3   : > { %617 = vmatmul.mubr.bf16.gmra.mrb[12].mxu0 %v1329_v26 }
  0xa4   : > { %624 = vmatprep.mubr.bf16.mxu0 %v1330_v27 }
  0xab   : > { %625 = vmatmul.mubr.bf16.gmra.mrb[16].mxu0 %v1332_v28 }
  0xac   : > { %632 = vmatprep.mubr.bf16.mxu0 %v1333_v29 }
  0xb3   : > { %633 = vmatmul.mubr.bf16.gmra.mrb[20].mxu0 %v1335_v30 }
  0xb4   : > { %640 = vmatprep.mubr.bf16.mxu0 %v1336_v31 }
  0xbb   : > { %641 = vmatmul.mubr.bf16.gmra.mrb[24].mxu0 %v1338_v32 }
  0xbc   : > { %648 = vmatprep.mubr.bf16.mxu0 %v1339_v33 }
  0xc3   : > { %649 = vmatmul.mubr.bf16.gmra.mrb[28].mxu0 %v1341_v34 }
 0x15e   : > { %v1102_v40 = vpop.f32.mrb[0].mxu0 }
 0x15f   : > { %v1103_v41 = vpop.f32.mrb[1].mxu0 }
 0x160   : > { %v1104_v43 = vadd.f32 %v1103_v41, %v1102_v40  ;;  %v1105_v44 = vpop.f32.mrb[2].mxu0 }
 0x161   : > { %v1106_v45 = vpop.f32.mrb[3].mxu0 }
 0x162   : > { %v1107_v46 = vadd.f32 %v1106_v45, %v1105_v44  ;;  %v595_v47 = vadd.f32 %v1104_v43, %v1764_v42 }
 0x164   : > { %v598_v48 = vadd.f32 %v1107_v46, %v1764_v42  ;;  %v657_v50 = vmax.f32 %v595_v47, 0.0 }
 0x166   : > { %v1108_v49 = vpop.f32.mrb[4].mxu0  ;;  %v658_v51 = vmax.f32 %v598_v48, 0.0 }
 0x167   : > { %v1109_v52 = vpop.f32.mrb[5].mxu0 }
 0x168   : > { %v1110_v53 = vadd.f32 %v1109_v52, %v1108_v49  ;;  %v1111_v54 = vpop.f32.mrb[6].mxu0  ;;  %v673_v55 = vpack.c.bf16 %v658_v51, %v657_v50 }
 0x169   : > { %v1112_v56 = vpop.f32.mrb[7].mxu0 }
 0x16a   : > { %v603_v57 = vadd.f32 %v1110_v53, %v1764_v42  ;;  %v1113_v58 = vadd.f32 %v1112_v56, %v1111_v54  ;;  %1191 = vmatprep.mubr.bf16.mxu1 %v673_v55 }
 0x16c   : > { %v606_v59 = vadd.f32 %v1113_v58, %v1764_v42  ;;  %v659_v60 = vmax.f32 %v603_v57, 0.0 }
 0x16e   : > { %v660_v61 = vmax.f32 %v606_v59, 0.0  ;;  %v1114_v62 = vpop.f32.mrb[8].mxu0 }
 0x16f   : > { %v1115_v63 = vpop.f32.mrb[9].mxu0 }
 0x170   : > { %v1116_v0 = vadd.f32 %v1115_v63, %v1114_v62  ;;  %v1117_v1 = vpop.f32.mrb[10].mxu0  ;;  %v674_v2 = vpack.c.bf16 %v660_v61, %v659_v60 }
 0x171   : > { %v1118_v3 = vpop.f32.mrb[11].mxu0 }
 0x172   : > { %v611_v4 = vadd.f32 %v1116_v0, %v1764_v42  ;;  %v1119_v5 = vadd.f32 %v1118_v3, %v1117_v1  ;;  %1192 = vmatmul.mubr.bf16.vlgmr.msra.gmra.mrb[0].mxu1 %v674_v2  ;;  %v1515_v2 = vmov 0.0   ;;  %v874_v3 = vld [vmem:[%s1855_s6] sm:$0xff] }
 0x173   : > { %1207 = vmatprep.subr.bf16.mxu0 %v1515_v2  ;;  %1223 = vmatprep.mubr.msk.bf16.mxu0 %vm1516_vm0, %v1515_v2 }
 0x174   : > { %v614_v6 = vadd.f32 %v1119_v5, %v1764_v42  ;;  %v661_v7 = vmax.f32 %v611_v4, 0.0  ;;  %v1517_v4 = vmov 0  }
 0x175   : > { %1301 = vset.pattern.permute.xlu0 %v1517_v4 }
 0x176   : > { %v662_v8 = vmax.f32 %v614_v6, 0.0  ;;  %v1120_v9 = vpop.f32.mrb[12].mxu0  ;;  %877 = vperm.xlu0 %1301, %v874_v3  }
 0x177   : > { %v1121_v10 = vpop.f32.mrb[13].mxu0 }
 0x178   : > { %v1122_v11 = vadd.f32 %v1121_v10, %v1120_v9  ;;  %v1123_v12 = vpop.f32.mrb[14].mxu0  ;;  %v675_v13 = vpack.c.bf16 %v662_v8, %v661_v7 }
 0x179   : > { %v1124_v14 = vpop.f32.mrb[15].mxu0 }
 0x17a   : > { %v619_v15 = vadd.f32 %v1122_v11, %v1764_v42  ;;  %v1125_v16 = vadd.f32 %v1124_v14, %v1123_v12  ;;  %1195 = vmatprep.mubr.bf16.mxu1 %v675_v13 }
 0x17c   : > { %v622_v17 = vadd.f32 %v1125_v16, %v1764_v42  ;;  %v663_v18 = vmax.f32 %v619_v15, 0.0 }
 0x17e   : > { %v664_v19 = vmax.f32 %v622_v17, 0.0  ;;  %v1126_v20 = vpop.f32.mrb[16].mxu0 }
 0x17f   : > { %v1127_v21 = vpop.f32.mrb[17].mxu0 }
 0x180   : > { %v1128_v22 = vadd.f32 %v1127_v21, %v1126_v20  ;;  %v1129_v23 = vpop.f32.mrb[18].mxu0  ;;  %v676_v24 = vpack.c.bf16 %v664_v19, %v663_v18 }
 0x181   : > { %v1130_v25 = vpop.f32.mrb[19].mxu0 }
 0x182   : > { %v627_v26 = vadd.f32 %v1128_v22, %v1764_v42  ;;  %v1131_v27 = vadd.f32 %v1130_v25, %v1129_v23  ;;  %1196 = vmatmul.mubr.bf16.gmra.mrb[4].mxu1 %v676_v24 }
 0x184   : > { %v630_v28 = vadd.f32 %v1131_v27, %v1764_v42  ;;  %v665_v29 = vmax.f32 %v627_v26, 0.0 }
 0x186   : > { %v666_v30 = vmax.f32 %v630_v28, 0.0  ;;  %v1132_v31 = vpop.f32.mrb[20].mxu0 }
 0x187   : > { %v1133_v32 = vpop.f32.mrb[21].mxu0 }
 0x188   : > { %v1134_v33 = vadd.f32 %v1133_v32, %v1132_v31  ;;  %v1135_v34 = vpop.f32.mrb[22].mxu0  ;;  %v677_v35 = vpack.c.bf16 %v666_v30, %v665_v29 }
 0x189   : > { %v1136_v36 = vpop.f32.mrb[23].mxu0 }
 0x18a   : > { %v635_v37 = vadd.f32 %v1134_v33, %v1764_v42  ;;  %v1137_v38 = vadd.f32 %v1136_v36, %v1135_v34  ;;  %1199 = vmatprep.mubr.bf16.mxu1 %v677_v35 }
 0x18c   : > { %v638_v39 = vadd.f32 %v1137_v38, %v1764_v42  ;;  %v667_v40 = vmax.f32 %v635_v37, 0.0 }
 0x18e   : > { %v668_v41 = vmax.f32 %v638_v39, 0.0  ;;  %v1138_v43 = vpop.f32.mrb[24].mxu0 }
 0x18f   : > { %v1139_v44 = vpop.f32.mrb[25].mxu0 }
 0x190   : > { %v1140_v45 = vadd.f32 %v1139_v44, %v1138_v43  ;;  %v1141_v46 = vpop.f32.mrb[26].mxu0  ;;  %v678_v47 = vpack.c.bf16 %v668_v41, %v667_v40 }
 0x191   : > { %v1142_v48 = vpop.f32.mrb[27].mxu0 }
 0x192   : > { %v643_v49 = vadd.f32 %v1140_v45, %v1764_v42  ;;  %v1143_v50 = vadd.f32 %v1142_v48, %v1141_v46  ;;  %1200 = vmatmul.mubr.bf16.gmra.mrb[8].mxu1 %v678_v47 }
 0x194   : > { %v646_v51 = vadd.f32 %v1143_v50, %v1764_v42  ;;  %v669_v52 = vmax.f32 %v643_v49, 0.0 }
 0x196   : > { %v670_v53 = vmax.f32 %v646_v51, 0.0  ;;  %v1144_v54 = vpop.f32.mrb[28].mxu0 }
 0x197   : > { %v1145_v55 = vpop.f32.mrb[29].mxu0 }
 0x198   : > { %v1146_v56 = vadd.f32 %v1145_v55, %v1144_v54  ;;  %v1147_v57 = vpop.f32.mrb[30].mxu0  ;;  %v679_v58 = vpack.c.bf16 %v670_v53, %v669_v52 }
 0x199   : > { %v1148_v59 = vpop.f32.mrb[31].mxu0 }
 0x19a   : > { %v651_v60 = vadd.f32 %v1146_v56, %v1764_v42  ;;  %v1149_v61 = vadd.f32 %v1148_v59, %v1147_v57  ;;  %1203 = vmatprep.mubr.bf16.mxu1 %v679_v58 }
 0x19c   : > { %v654_v62 = vadd.f32 %v1149_v61, %v1764_v42  ;;  %v671_v63 = vmax.f32 %v651_v60, 0.0  ;;  %v1071_v42 = vld [vmem:[%s1853_s4] ss:$0 sm:$0xff] }
 0x19e   : > { %v672_v0 = vmax.f32 %v654_v62, 0.0  ;;  %v865_v62 = vld [vmem:[%s1854_s5] sm:$0xf] }
 0x1a0   : > { %v680_v1 = vpack.c.bf16 %v672_v0, %v671_v63 }
 0x1a2   : > { %1204 = vmatmul.mubr.bf16.gmra.mrb[12].mxu1 %v680_v1 }
 0x1f5   : > { %v878_v63 = vpop.permute.xlu0 %877 }
 0x245   : > { %v1193_v5 = vpop.f32.mrb[0].mxu1 }
 0x246   : > { %v795_v6 = vadd.f32 %v1193_v5, %v1071_v42  ;;  %v786_v7 = vpop.f32.mrb[1].mxu1 }
 0x247   : > { %v787_v8 = vadd.f32 %v1071_v42, %v786_v7  ;;  %v1194_v9 = vpop.f32.mrb[2].mxu1 }
 0x248   : > { %v798_v10 = vadd.f32 %v1194_v9, %v1071_v42  ;;  %v789_v11 = vpop.f32.mrb[3].mxu1  ;;  %v851_v13 = vmax.f32 %v795_v6, 0.0 }
 0x249   : > { %v790_v12 = vadd.f32 %v1071_v42, %v789_v11  ;;  %v849_v15 = vmax.f32 %v787_v8, 0.0 }
 0x24a   : > { %v852_v14 = vmax.f32 %v798_v10, 0.0 }
 0x24b   : > { %v850_v16 = vmax.f32 %v790_v12, 0.0 }
 0x24c   : > { %v867_v17 = vpack.c.bf16 %v852_v14, %v851_v13 }
 0x24d   : > { %v866_v18 = vpack.c.bf16 %v850_v16, %v849_v15 }
 0x24f   : > { %1208 = vmatpush3.bf16.xpose.msra.mxu0 %v866_v18 }
 0x250   : > { %1209 = vmatprep.subr.bf16.mxu0 %v1515_v2 }
 0x255   : > { %v1197_v19 = vpop.f32.mrb[4].mxu1 }
 0x256   : > { %v811_v20 = vadd.f32 %v1197_v19, %v1071_v42  ;;  %v802_v21 = vpop.f32.mrb[5].mxu1 }
 0x257   : > { %v803_v22 = vadd.f32 %v1071_v42, %v802_v21  ;;  %v1198_v23 = vpop.f32.mrb[6].mxu1  ;;  %1210 = vmatpush3.bf16.xpose.msra.mxu0 %v867_v17 }
 0x258   : > { %v814_v24 = vadd.f32 %v1198_v23, %v1071_v42  ;;  %v805_v25 = vpop.f32.mrb[7].mxu1  ;;  %1211 = vmatprep.subr.bf16.mxu0 %v1515_v2  ;;  %v855_v27 = vmax.f32 %v811_v20, 0.0 }
 0x259   : > { %v806_v26 = vadd.f32 %v1071_v42, %v805_v25  ;;  %v853_v29 = vmax.f32 %v803_v22, 0.0 }
 0x25a   : > { %v856_v28 = vmax.f32 %v814_v24, 0.0 }
 0x25b   : > { %v854_v30 = vmax.f32 %v806_v26, 0.0 }
 0x25c   : > { %v869_v31 = vpack.c.bf16 %v856_v28, %v855_v27 }
 0x25d   : > { %v868_v32 = vpack.c.bf16 %v854_v30, %v853_v29 }
 0x25f   : > { %1212 = vmatpush3.bf16.xpose.msra.mxu0 %v868_v32 }
 0x260   : > { %1213 = vmatprep.subr.bf16.mxu0 %v1515_v2 }
 0x265   : > { %v1201_v33 = vpop.f32.mrb[8].mxu1 }
 0x266   : > { %v827_v34 = vadd.f32 %v1201_v33, %v1071_v42  ;;  %v818_v35 = vpop.f32.mrb[9].mxu1 }
 0x267   : > { %v819_v36 = vadd.f32 %v1071_v42, %v818_v35  ;;  %v1202_v37 = vpop.f32.mrb[10].mxu1  ;;  %1214 = vmatpush3.bf16.xpose.msra.mxu0 %v869_v31 }
 0x268   : > { %v830_v38 = vadd.f32 %v1202_v37, %v1071_v42  ;;  %v821_v39 = vpop.f32.mrb[11].mxu1  ;;  %1215 = vmatprep.subr.bf16.mxu0 %v1515_v2  ;;  %v859_v41 = vmax.f32 %v827_v34, 0.0 }
 0x269   : > { %v822_v40 = vadd.f32 %v1071_v42, %v821_v39  ;;  %v857_v44 = vmax.f32 %v819_v36, 0.0 }
 0x26a   : > { %v860_v43 = vmax.f32 %v830_v38, 0.0 }
 0x26b   : > { %v858_v45 = vmax.f32 %v822_v40, 0.0 }
 0x26c   : > { %v871_v46 = vpack.c.bf16 %v860_v43, %v859_v41 }
 0x26d   : > { %v870_v47 = vpack.c.bf16 %v858_v45, %v857_v44 }
 0x26f   : > { %1216 = vmatpush3.bf16.xpose.msra.mxu0 %v870_v47 }
 0x270   : > { %1217 = vmatprep.subr.bf16.mxu0 %v1515_v2 }
 0x275   : > { %v1205_v48 = vpop.f32.mrb[12].mxu1 }
 0x276   : > { %v843_v49 = vadd.f32 %v1205_v48, %v1071_v42  ;;  %v834_v50 = vpop.f32.mrb[13].mxu1 }
 0x277   : > { %v835_v51 = vadd.f32 %v1071_v42, %v834_v50  ;;  %v1206_v52 = vpop.f32.mrb[14].mxu1  ;;  %1218 = vmatpush3.bf16.xpose.msra.mxu0 %v871_v46 }
 0x278   : > { %v846_v53 = vadd.f32 %v1206_v52, %v1071_v42  ;;  %v837_v54 = vpop.f32.mrb[15].mxu1  ;;  %1219 = vmatprep.subr.bf16.mxu0 %v1515_v2  ;;  %v863_v56 = vmax.f32 %v843_v49, 0.0 }
 0x279   : > { %v838_v55 = vadd.f32 %v1071_v42, %v837_v54  ;;  %v861_v58 = vmax.f32 %v835_v51, 0.0 }
 0x27a   : > { %v864_v57 = vmax.f32 %v846_v53, 0.0 }
 0x27b   : > { %v862_v59 = vmax.f32 %v838_v55, 0.0 }
 0x27c   : > { %v873_v60 = vpack.c.bf16 %v864_v57, %v863_v56 }
 0x27d   : > { %v872_v61 = vpack.c.bf16 %v862_v59, %v861_v58 }
 0x27f   : > { %1220 = vmatpush3.bf16.xpose.msra.mxu0 %v872_v61 }
 0x280   : > { %1221 = vmatprep.subr.bf16.mxu0 %v1515_v2 }
 0x287   : > { %1222 = vmatpush3.bf16.xpose.msra.mxu0 %v873_v60 }
 0x28e   : > { %1224 = vmatmul.mubr.bf16.vlgmr.msra.gmra.mrb[32].mxu0 %v865_v62 }
 0x361   : > { %v914_v0 = vpop.f32.mrb[32].mxu0 }
 0x362   : > { %v915_v1 = vadd.f32 %v914_v0, %v878_v63  ;;  %v1225_v3 = vpop.f32.mrb[33].mxu0 }
 0x363   : > { %v917_v2 = vpop.f32.mrb[34].mxu0 }
 0x364   : > { %920 = vst [vmem:[%s326_s29] sm:$0xff] %v915_v1  ;;  %v1226_v4 = vpop.f32.mrb[35].mxu0 }
 0x365   : > { %1449 = shalt.err (!%p1446_p2)
}
 0x366   : > { %s1450_s23 = scalar_lea.hbm %s1805_s9, 128  ;;  %s1454_s12 = scalar_lea.hbm %s1856_s7, 256 }
 0x367   : > { %p1451_p13 = scmp.ne.s32.totalorder %s1805_s9, %s1450_s23  ;;  %p1455_p4 = scmp.lt.u32.totalorder %s1805_s9, %s1856_s7 }
 0x368   : > { %p1456_p5 = scmp.lt.u32.totalorder %s1454_s12, %s1450_s23  ;;  %p1458_p11 = scmp.lt.u32.totalorder %s1450_s23, %s1805_s9 }
 0x369   : > { %p1452_p6 = pnand %p1451_p13, %p1870_p0 }
 0x36a   : > { %p1457_p8 = por %p1456_p5, %p1455_p4 }
 0x36b   : > { %p1453_p10 = pneg %p1452_p6 }
 0x36c   : > { %p1459_p1 = por %p1458_p11, %p1457_p8 }
 0x36e   : > { %p1460_p3 = pnand %p1459_p1, %p1453_p10 }
 0x370   : > { %1463 = shalt.err (!%p1460_p3)
}
 0x371   : > { %1237 = dma.vmem_to_hbm [thread:$0]  (%p1870_p0), %s1807_s18, 128, %s1805_s9, %s922_s20  }
 0x372 PF: > { %s947_s21 = sand.u32 1, %s1494_s24   ;;  %p1871_p7 = scmp.ne.s32.totalorder %s1861_s8, 0 }
 0x373   : > { %p1872_p9 = scmp.ge.s32.totalorder %s1506_s27, 2  ;;  %s948_s30 = scalar_lea.sflag [#allocation4], %s947_s21 }
 0x375   : > { %p1251_p12 = pnand %p1872_p9, %p1871_p7 }
 0x377   : > { %1489 = dma.done.wait (!%p1251_p12), %s948_s30, 128  }
 0x378   : > { %1491 = vsyncadd (!%p1251_p12), %s948_s30, 4294967168  ;;  %p21_p2 = scmp.ge.s32.totalorder %s1669_s13, 4   ;;  %s1873_s24 = smov %s1498_s25 }
 0x379   : > { %s1874_s25 = smov %s1502_s26  ;;  %s1875_s26 = smov %s1685_s17 }
 0x37a   : > { %s1876_s27 = smov %s1669_s13  ;;  %23 = sbr.rel (!%p21_p2) target bundleno = 6 (0x6), region = 101 }
 0x381   :  { %953 = vsyncpa [#allocation3], 1 }
 0x382   :  { %955 = vsyncpa [#allocation3 + $0x1], 1 }
 0x383   :  { %956 = vsyncpa [#allocation6], 1 }
 0x384   :  { %957 = vsyncpa [#allocation4], 1 }
 0x385   :  { %959 = vsyncpa [#allocation4 + $0x1], 1 }

</bundles_post_ra>
